<compile_context>
chip_gen: v5e
topology: v5e:2x2
jax: 0.10.0
libtpu: 0.0.40
codegen_flags: <defaults>
</compile_context>

<pallas_src>
from functools import partial

import jax
import jax.numpy as jnp
import numpy as np
from jax.experimental import pallas as pl
from jax.experimental.pallas import tpu as pltpu


# --- "irreps" description without e3nn: list of (multiplicity, ir_dim) -------
# "8x0e + 4x1e" per head: scalar dim 1, vector dim 3.
IRREPS_HEAD = [(8, 1), (4, 3)]          # head_dim = 8*1 + 4*3 = 20
NUM_HEADS = 4                            # irreps_mid dim = 4 * 20 = 80

_LANE = 128


def build_segments(irreps_head, num_heads):
    """Per-irrep (input_start, per_head_width). Mirrors mid_in_indices."""
    segs = []
    start = 0
    for mul, d in irreps_head:
        per_head_w = mul * d
        segs.append((start, per_head_w))
        start += per_head_w * num_heads
    c_mid = start
    head_dim = sum(w for _, w in segs)
    return segs, c_mid, head_dim


def _round_up(x, m):
    return ((x + m - 1) // m) * m


def _sublane(dtype):
    # rows per vreg: 8 for 4-byte types, 16 for bf16/fp16, 32 for int8/fp8
    return max(8, 32 // jnp.dtype(dtype).itemsize)


def _perm_matrix(segs, num_heads, c_mid, head_dim, dtype):
    """Constant 0/1 matrix P with (x @ P)[:, col] == regrouped column."""
    p = np.zeros((c_mid, num_heads * head_dim), dtype=np.float32)
    col = 0
    for h in range(num_heads):
        for (start, w) in segs:
            for j in range(w):
                p[start + h * w + j, col] = 1.0
                col += 1
    return jnp.asarray(p, dtype=dtype)


def _regroup_kernel(x_ref, o_ref, *, segs, num_heads):
    """One load, value-level column regroup, one full-width dense store."""
    x = x_ref[...]                               # [bn, C_mid]
    parts = []
    for h in range(num_heads):                   # static -> unrolled lane slices
        for (start, w) in segs:
            parts.append(x[:, start + h * w: start + (h + 1) * w])
    o_ref[...] = jnp.concatenate(parts, axis=1)  # [bn, num_heads*head_dim]


def _regroup_mxu_kernel(x_ref, p_ref, o_ref):
    """Regroup via a 0/1 permutation matmul on the otherwise-idle MXU (v7x)."""
    acc = jnp.dot(x_ref[...], p_ref[...],
                  preferred_element_type=jnp.float32,
                  precision=jax.lax.Precision.HIGHEST)
    o_ref[...] = acc.astype(o_ref.dtype)


def vec2attnheads(x, irreps_head=IRREPS_HEAD, num_heads=NUM_HEADS,
                  block_n=8192, use_mxu=False):
    segs, c_mid, head_dim = build_segments(irreps_head, num_heads)
    N, C = x.shape
    assert C == c_mid, f"expected irreps_mid dim {c_mid}, got {C}"
    out_w = num_heads * head_dim
    itemsize = jnp.dtype(x.dtype).itemsize
    sub = _sublane(x.dtype)

    # --- row-tile size -------------------------------------------------------
    # lane-padded, double-buffered (in + out) VMEM bytes per row of the tile
    row_bytes = (_round_up(C, _LANE) + _round_up(out_w, _LANE)) * itemsize * 2
    budget = 48 << 20                       # keep double-buffering on v7x (64 MiB/TC)
    bn = _round_up(max(block_n, sub), sub)
    bn = min(bn, max(sub, (budget // row_bytes) // sub * sub))
    # >= 2 balanced grid steps so both v7x TensorCores get work
    bn = min(bn, _round_up(pl.cdiv(N, 2), sub))
    grid = (pl.cdiv(N, bn),)

    vmem_limit = int(min(max(bn * row_bytes + (2 << 20), 16 << 20), 56 << 20))

    cparams = pltpu.CompilerParams(
        dimension_semantics=("parallel",),
        vmem_limit_bytes=vmem_limit,
    )
    cost = pl.CostEstimate(flops=0, transcendentals=0,
                           bytes_accessed=2 * N * C * itemsize)

    if use_mxu:
        p = _perm_matrix(segs, num_heads, c_mid, head_dim, x.dtype)
        kernel = _regroup_mxu_kernel
        in_specs = [pl.BlockSpec((bn, C), lambda i: (i, 0)),
                    pl.BlockSpec((c_mid, out_w), lambda i: (0, 0))]  # resident
        args = (x, p)
    else:
        kernel = partial(_regroup_kernel, segs=segs, num_heads=num_heads)
        in_specs = [pl.BlockSpec((bn, C), lambda i: (i, 0))]
        args = (x,)

    out2d = pl.pallas_call(
        kernel,
        out_shape=jax.ShapeDtypeStruct((N, out_w), x.dtype),
        grid_spec=pltpu.PrefetchScalarGridSpec(
            num_scalar_prefetch=0,
            grid=grid,
            in_specs=in_specs,
            out_specs=pl.BlockSpec((bn, out_w), lambda i: (i, 0)),
        ),
        compiler_params=cparams,
        cost_estimate=cost,
        input_output_aliases={0: 0},   # donate x; same shape/dtype, rows disjoint
    )(*args)
    # glue: lane-dense 2D slab -> the module's [N, num_heads, head_dim] output
    return out2d.reshape(N, num_heads, head_dim)


def vec2attnheads_ref(x, irreps_head=IRREPS_HEAD, num_heads=NUM_HEADS):
    """Pure-JAX reference matching the PyTorch forward exactly."""
    N = x.shape[0]
    out = []
    start = 0
    for mul, d in irreps_head:
        width_total = mul * num_heads * d
        seg = x[:, start:start + width_total].reshape(N, num_heads, mul * d)
        out.append(seg)
        start += width_total
    return jnp.concatenate(out, axis=2)


if __name__ == "__main__":
    # Module has no learnable parameters; nothing to initialize.
    segs, c_mid, head_dim = build_segments(IRREPS_HEAD, NUM_HEADS)
    key = jax.random.PRNGKey(0)

    # small deterministic f32 example (single tile)
    N = 8
    x = jax.random.normal(key, (N, c_mid), dtype=jnp.float32)       # [8, 80]
    ref = vec2attnheads_ref(x)
    out = jax.block_until_ready(vec2attnheads(x))
    assert out.shape == (N, NUM_HEADS, head_dim), out.shape
    assert jnp.array_equal(out, ref), "mismatch vs. reference (single-tile)"

    # multi-tile pipelined grid with a partial last tile
    N2 = 200
    x2 = jax.random.normal(jax.random.PRNGKey(0), (N2, c_mid), dtype=jnp.float32)
    ref2 = vec2attnheads_ref(x2)
    out2 = jax.block_until_ready(vec2attnheads(x2, block_n=64))
    assert jnp.array_equal(out2, ref2), "mismatch vs. reference (multi-tile)"

    # bf16 path exercises the dtype-aware sublane rounding (multiple of 16)
    x3 = jax.random.normal(jax.random.PRNGKey(0), (48, c_mid), dtype=jnp.bfloat16)
    ref3 = vec2attnheads_ref(x3)
    out3 = jax.block_until_ready(vec2attnheads(x3, block_n=32))
    assert jnp.array_equal(out3, ref3), "mismatch vs. reference (bf16)"

    # MXU permutation-matrix variant (intended for v7x where XLU rotates bind)
    out4 = jax.block_until_ready(vec2attnheads(x2, block_n=64, use_mxu=True))
    assert jnp.allclose(out4, ref2, rtol=1e-4, atol=1e-5), "mismatch (MXU variant)"

    print("KERNEL_OK")
</pallas_src>

<mosaic_0001>
module attributes {stable_mosaic.version = 11 : i64} {
  func.func @_regroup_kernel(%arg0: i32, %arg1: memref<8x80xf32, #tpu.memory_space<vmem>>, %arg2: memref<8x80xf32, #tpu.memory_space<vmem>>) attributes {dimension_semantics = [#tpu.dimension_semantics<parallel>], iteration_bounds = array<i64: 1>, scalar_prefetch = 0 : i64, scratch_operands = 0 : i64, tpu.core_type = #tpu.core_type<tc>, window_params = [{transform_indices = @transform_0, window_bounds = array<i64: 8, 80>}, {transform_indices = @transform_1, window_bounds = array<i64: 8, 80>}]} {
    %c0 = arith.constant 0 : index
    %c0_0 = arith.constant 0 : index
    %0 = vector.load %arg1[%c0, %c0_0] : memref<8x80xf32, #tpu.memory_space<vmem>>, vector<8x80xf32>
    %1 = vector.extract_strided_slice %0 {offsets = [0, 0], sizes = [8, 8], strides = [1, 1]} : vector<8x80xf32> to vector<8x8xf32>
    %2 = vector.extract_strided_slice %0 {offsets = [0, 32], sizes = [8, 12], strides = [1, 1]} : vector<8x80xf32> to vector<8x12xf32>
    %3 = vector.extract_strided_slice %0 {offsets = [0, 8], sizes = [8, 8], strides = [1, 1]} : vector<8x80xf32> to vector<8x8xf32>
    %4 = vector.extract_strided_slice %0 {offsets = [0, 44], sizes = [8, 12], strides = [1, 1]} : vector<8x80xf32> to vector<8x12xf32>
    %5 = vector.extract_strided_slice %0 {offsets = [0, 16], sizes = [8, 8], strides = [1, 1]} : vector<8x80xf32> to vector<8x8xf32>
    %6 = vector.extract_strided_slice %0 {offsets = [0, 56], sizes = [8, 12], strides = [1, 1]} : vector<8x80xf32> to vector<8x12xf32>
    %7 = vector.extract_strided_slice %0 {offsets = [0, 24], sizes = [8, 8], strides = [1, 1]} : vector<8x80xf32> to vector<8x8xf32>
    %8 = vector.extract_strided_slice %0 {offsets = [0, 68], sizes = [8, 12], strides = [1, 1]} : vector<8x80xf32> to vector<8x12xf32>
    %9 = tpu.concatenate %1, %2, %3, %4, %5, %6, %7, %8 in 1 : vector<8x8xf32>, vector<8x12xf32>, vector<8x8xf32>, vector<8x12xf32>, vector<8x8xf32>, vector<8x12xf32>, vector<8x8xf32>, vector<8x12xf32> -> vector<8x80xf32>
    %c0_1 = arith.constant 0 : index
    %c0_2 = arith.constant 0 : index
    %10 = vector.load %arg2[%c0_1, %c0_2] : memref<8x80xf32, #tpu.memory_space<vmem>>, vector<8x80xf32>
    tpu.vector_store %arg2[%c0_1, %c0_2], %9 {strides = array<i32>} : memref<8x80xf32, #tpu.memory_space<vmem>>, vector<8x80xf32>,
    return
  }
  func.func @transform_0(%arg0: i32) -> (i32, i32) {
    %c0_i32 = arith.constant 0 : i32
    %c0_i32_0 = arith.constant 0 : i32
    return %arg0, %c0_i32 : i32, i32
  }
  func.func @transform_1(%arg0: i32) -> (i32, i32) {
    %c0_i32 = arith.constant 0 : i32
    %c0_i32_0 = arith.constant 0 : i32
    return %arg0, %c0_i32 : i32, i32
  }
}

</mosaic_0001>

<bundles_post_ra>
// kernel: tpu_custom_call.1
= control target key start
LH: loop header
LB: loop body
LE: loop exit
PB: predicated region body
PF: predicated region fallthrough
CT: control target
= control target key end

     0   :  { %6 = vsyncpa [#allocation3], 0  ;;  %s160_s0 = inlined_call_operand.hbm [shape: f32[8,80], index: 0, kind: input, shape index: {}, may-alias: {0,1}]   ;;  %s161_s1 = inlined_call_operand.hbm [shape: f32[8,80], index: 1, kind: output, shape index: {}, may-alias: {0,1}]  }
   0x1   :  { %7 = vsyncpa [#allocation4], 0  ;;  %s13_s8 = sshll.u32 %s160_s0, 4  ;;  %s136_s9 = smov [#allocation2]   ;;  %s14_s8 = int_to_ptr.hbm [resolvable:$true] %s13_s8 }
   0x2   :  { %s15_s10 = sshll.u32 %s136_s9, 4  ;;  %s16_s10 = int_to_ptr.vmem [resolvable:$true] %s15_s10 }
   0x3   :  { %18 = dma.hbm_to_vmem [thread:$0]  %s14_s8, 128, %s16_s10, [#allocation3]  }
   0x4   :  { %132 = dma.done.wait [#allocation3], 128  }
   0x5   :  { %133 = vsyncadd [#allocation3], 4294967168  ;;  %v23_v0 = vld [vmem:[#allocation2] sm:$0xff]  ;;  %s137_s11 = smov 104   ;;  %s138_s12 = smov 112   ;;  %vm43_vm0 = vcmask 64512  }
   0x6   :  { %25 = vrot.lane.b32.xlu0 %v23_v0, %s137_s11  ;;  %31 = vrot.lane.b32.xlu1 %v23_v0, %s138_s12  ;;  %s139_s13 = smov 120   ;;  %s140_s14 = smov 12   ;;  %vm45_vm1 = vcmask 162816   ;;  %vm47_vm2 = vcmask 228352   ;;  %vm49_vm3 = vcmask 326656   ;;  %vm51_vm4 = vcmask 392192  }
   0x7   :  { %37 = vrot.lane.b32.xlu2 %v23_v0, %s139_s13  ;;  %s141_s15 = smov 24   ;;  %s142_s16 = smov 36   ;;  %vm53_vm5 = vcmask 490496   ;;  %vm55_vm6 = vcmask 556032   ;;  %vm57_vm7 = vcmask 654336  }
   0x8   :  { %s143_s0 = smov [#allocation5]   ;;  %s66_s20 = sshll.u32 %s161_s1, 4  ;;  %s67_s20 = int_to_ptr.hbm [resolvable:$true] %s66_s20 }
   0x9   :  { %s64_s17 = sshll.u32 %s143_s0, 4  ;;  %s65_s17 = int_to_ptr.vmem [resolvable:$true] %s64_s17 }
   0xe   :  { %28 = vrot.lane.b32.xlu0 %v23_v0, %s140_s14  ;;  %34 = vrot.lane.b32.xlu1 %v23_v0, %s141_s15 }
   0xf   :  { %40 = vrot.lane.b32.xlu2 %v23_v0, %s142_s16 }
  0x61   :  { %v38_v1 = vpop.permute.xlu2 %37 }
  0x69   :  { %v41_v9 = vpop.permute.xlu2 %40 }
  0x78   :  { %v26_v2 = vpop.permute.xlu0 %25  ;;  %v32_v3 = vpop.permute.xlu1 %31 }
  0x79   :  { %v44_v4 = vsel %vm43_vm0, %v23_v0, %v26_v2 }
  0x80   :  { %v29_v5 = vpop.permute.xlu0 %28  ;;  %v35_v6 = vpop.permute.xlu1 %34 }
  0x81   :  { %v46_v7 = vsel %vm45_vm1, %v44_v4, %v29_v5 }
  0x82   :  { %v48_v8 = vsel %vm47_vm2, %v46_v7, %v32_v3 }
  0x83   :  { %v50_v10 = vsel %vm49_vm3, %v48_v8, %v35_v6 }
  0x84   :  { %v52_v11 = vsel %vm51_vm4, %v50_v10, %v38_v1 }
  0x85   :  { %v54_v12 = vsel %vm53_vm5, %v52_v11, %v41_v9 }
  0x86   :  { %v56_v13 = vsel %vm55_vm6, %v54_v12, %v23_v0 }
  0x87   :  { %58 = vst.msk [vmem:[#allocation5] sm:$0xff] %vm57_vm7, %v56_v13 }
  0x88   :  { %69 = dma.vmem_to_hbm [thread:$0]  %s65_s17, 128, %s67_s20, [#allocation4]  }
  0x89   :  { %134 = dma.done.wait [#allocation4], 128  }
  0x8a   :  { %135 = vsyncadd [#allocation4], 4294967168 }
  0x8b   :  { %74 = vsyncpa [#allocation3], 1 }
  0x8c   :  { %75 = vsyncpa [#allocation4], 1 }

</bundles_post_ra>
